<compile_context>
chip_gen: v7x
topology: tpu7x:2x2x1
jax: 0.10.0
libtpu: 0.0.40
codegen_flags: <defaults>
</compile_context>

<pallas_src>
import functools

import jax
import jax.numpy as jnp
from jax.experimental import pallas as pl
from jax.experimental.pallas import tpu as pltpu


_EPS = 1e-5
_LANE = 128


# ----------------------------------------------------------------------------
# XLA glue: FFT low-pass branch (only consumed through its global spatial mean)
# ----------------------------------------------------------------------------
def _gaussian_lowpass_fft(x, d0=10.0):
    # TODO(synk): there is no Pallas/Mosaic FFT primitive on TPU; this branch
    # stays as XLA glue and feeds the kernel only through a global spatial mean.
    _, _, h, w = x.shape
    yy, zz = jnp.meshgrid(jnp.arange(h), jnp.arange(w), indexing="ij")
    cy, cz = (h - 1) // 2, (w - 1) // 2
    dis_sq = (yy - cy) ** 2 + (zz - cz) ** 2
    filt_shifted = jnp.exp(-dis_sq.astype(jnp.float32) / (2.0 * d0 * d0))
    # Move the tiny (H, W) filter to unshifted frequency coordinates once:
    #   ifftshift(fftshift(F) * filt) == F * ifftshift(filt)
    # so no full-tensor fftshift/ifftshift pass over the complex spectrum runs.
    filt = jnp.fft.ifftshift(filt_shifted)
    # rfft2/irfft2 intentionally not used (would symmetrize a non-Hermitian
    # spectrum and change numerics for even H/W).
    freq = jnp.fft.fft2(x.astype(jnp.float32))
    return jnp.abs(jnp.fft.ifft2(freq * filt)).astype(jnp.float32)


# ----------------------------------------------------------------------------
# Tile sizing (VMEM-budget- and generation-aware)
# ----------------------------------------------------------------------------
def _vmem_capacity_bytes():
    try:
        return int(pltpu.get_tpu_info().vmem_capacity_bytes)
    except Exception:
        return 64 << 20  # conservative fallback (v7x per-core VMEM)


def _pick_tile(l_pad, c, c_out, in_eb, out_eb):
    """Largest lane tile TL (multiple of 128, dividing l_pad) under VMEM budget."""
    cap = _vmem_capacity_bytes()
    budget = cap // 2  # leave headroom for compiler temps / scratch
    # pass-2 peak working set per lane of TL:
    #   2*C*in_eb (double-buffered x) + 2*Cout*out_eb (double-buffered out)
    # + Cout*4    (f32 y intermediate)
    per_lane = 2 * c * in_eb + 2 * c_out * out_eb + c_out * 4
    tl_cap = max(_LANE, (budget // max(per_lane, 1)) // _LANE * _LANE)
    tl_cap = min(tl_cap, 32768, l_pad)
    tl = _LANE
    t = _LANE
    while t <= tl_cap:
        if l_pad % t == 0:
            tl = t
        t += _LANE
    return tl, cap


def _vmem_limit_bytes(cap, need):
    return int(min(int(cap * 0.85), max(2 * need, 32 << 20)))


# ----------------------------------------------------------------------------
# Pallas kernels
# ----------------------------------------------------------------------------
def _stats_kernel(x_ref, w_ref, stats_ref):
    # x_ref    : (1, C, TL)      input tile (bf16 or f32), spatial on lanes
    # w_ref    : (1, Cout, C)    per-batch effective 1x1 weight (gate folded in)
    # stats_ref: (1, 1, Cout, 2) resident f32 accumulator: col 0 = sum(y),
    #                            col 1 = sum(y*y) over this batch's L-chunk
    @pl.when(pl.program_id(2) == 0)
    def _():
        stats_ref[...] = jnp.zeros_like(stats_ref)

    y = jnp.dot(w_ref[0], x_ref[0], preferred_element_type=jnp.float32)  # (Cout, TL) f32
    # TODO(synk): if the bundle shows the XLU slot saturated (v6e/v7x), move
    # these two cross-lane reductions onto the (idle) MXU via dots with a
    # ones-(TL, 1) column.
    stats_ref[0, 0, :, 0:1] += jnp.sum(y, axis=1, keepdims=True)
    stats_ref[0, 0, :, 1:2] += jnp.sum(y * y, axis=1, keepdims=True)


def _apply_kernel(x_ref, w_ref, shift_ref, out_ref):
    # x_ref    : (1, C, TL);  w_ref: (1, Cout, C) with BN scale folded in
    # shift_ref: (Cout, 1) f32;  out_ref: (1, Cout, TL) lane-dense stores
    y = jnp.dot(w_ref[0], x_ref[0], preferred_element_type=jnp.float32)
    out_ref[0] = jnp.maximum(y + shift_ref[...], 0.0).astype(out_ref.dtype)


# ----------------------------------------------------------------------------
# Wrapper
# ----------------------------------------------------------------------------
@functools.partial(jax.jit, static_argnames=("compute_dtype", "out_dtype"))
def feature_selection_fft_bn_relu(x, w_atten, w_conv, gamma, beta,
                                  compute_dtype=jnp.bfloat16,
                                  out_dtype=jnp.float32):
    """x: (N, C, H, W) f32; w_atten: (C, C); w_conv: (Cout, C); gamma/beta: (Cout,)."""
    n, c, h, w = x.shape
    c_out = w_conv.shape[0]
    l = h * w
    l_pad = ((l + _LANE - 1) // _LANE) * _LANE

    in_eb = jnp.dtype(compute_dtype).itemsize
    out_eb = jnp.dtype(out_dtype).itemsize
    tl, cap = _pick_tile(l_pad, c, c_out, in_eb, out_eb)
    n_l = l_pad // tl
    need = (2 * c * tl * in_eb + 2 * c_out * tl * out_eb
            + c_out * tl * 4 + 2 * c_out * c * in_eb + (1 << 20))
    vmem_limit = _vmem_limit_bytes(cap, need)

    # ---- XLA glue: shift-free FFT low-pass, global mean, attention gate -----
    freq_x = _gaussian_lowpass_fft(x)
    pooled = jnp.mean(freq_x, axis=(2, 3))                      # (N, C)
    atten = jax.nn.sigmoid(pooled @ w_atten.T)                  # (N, C) (conv bias=False)
    gate = 1.0 + atten                                          # x + x*atten == x*gate

    # Fold the per-(n, in-channel) gate into the 1x1 conv weight (tiny tensor).
    w_eff = w_conv[None, :, :] * gate[:, None, :]               # (N, Cout, C) f32

    # Flattened NCHW, spatial on lanes, padded to a multiple of 128 lanes.
    x_ncl = x.reshape(n, c, l).astype(compute_dtype)
    if l_pad != l:
        # Zero padding is exact: conv has no bias, so padded columns give y == 0
        # and contribute nothing to the BN sums (count below uses the real L).
        x_ncl = jnp.pad(x_ncl, ((0, 0), (0, 0), (0, l_pad - l)))
    w_eff_cd = w_eff.astype(compute_dtype)

    # Optional L-chunk split so both v7x TensorCores have parallel work at N==1.
    p = 2 if (n < 2 and n_l >= 2 and n_l % 2 == 0) else 1
    n_chunk = n_l // p

    # ---- pass 1: per-(chunk, batch) partial sums of y and y^2 (BN stats) ----
    stats = pl.pallas_call(
        _stats_kernel,
        out_shape=jax.ShapeDtypeStruct((p, n, c_out, 2), jnp.float32),
        grid=(p, n, n_chunk),
        in_specs=[
            pl.BlockSpec((1, c, tl), lambda pi, i, j: (i, 0, pi * n_chunk + j)),
            pl.BlockSpec((1, c_out, c), lambda pi, i, j: (i, 0, 0)),
        ],
        out_specs=pl.BlockSpec((1, 1, c_out, 2), lambda pi, i, j: (pi, i, 0, 0)),
        compiler_params=pltpu.CompilerParams(
            dimension_semantics=("parallel", "parallel", "arbitrary"),
            vmem_limit_bytes=vmem_limit),
    )(x_ncl, w_eff_cd)

    # BN (training mode): biased batch statistics over (N, H, W), f32.
    count = jnp.float32(n * l)
    sums = jnp.sum(stats[..., 0], axis=(0, 1))                  # (Cout,)
    sumsq = jnp.sum(stats[..., 1], axis=(0, 1))                 # (Cout,)
    mu = sums / count
    var = jnp.maximum(sumsq / count - mu * mu, 0.0)
    # TODO(synk): E[y^2] - E[y]^2 can cancel for very large L / activations;
    # switch to per-batch mean pre-subtraction if production sizes require it.
    scale = gamma * jax.lax.rsqrt(var + _EPS)                   # (Cout,)
    shift = (beta - mu * scale).reshape(c_out, 1).astype(jnp.float32)

    # Fold BN scale into the effective per-batch weight (still tiny).
    w_eff2 = (w_eff * scale[None, :, None]).astype(compute_dtype)

    # ---- pass 2: y = W_eff2 @ x + shift, ReLU, lane-dense output tiles ------
    out_ncl = pl.pallas_call(
        _apply_kernel,
        out_shape=jax.ShapeDtypeStruct((n, c_out, l_pad), out_dtype),
        grid=(n, n_l),
        in_specs=[
            pl.BlockSpec((1, c, tl), lambda i, j: (i, 0, j)),
            pl.BlockSpec((1, c_out, c), lambda i, j: (i, 0, 0)),
            pl.BlockSpec((c_out, 1), lambda i, j: (0, 0)),
        ],
        out_specs=pl.BlockSpec((1, c_out, tl), lambda i, j: (i, 0, j)),
        compiler_params=pltpu.CompilerParams(
            dimension_semantics=("parallel", "parallel"),
            vmem_limit_bytes=vmem_limit),
    )(x_ncl, w_eff2, shift)

    out = out_ncl[:, :, :l] if l_pad != l else out_ncl
    return out.reshape(n, c_out, h, w)


# ----------------------------------------------------------------------------
# Pure-JAX reference (literal PyTorch forward: shifted FFT path, train-mode BN)
# ----------------------------------------------------------------------------
def _reference(x, w_atten, w_conv, gamma, beta, d0=10.0):
    _, _, h, w = x.shape
    freq = jnp.fft.fft2(x.astype(jnp.float32))
    freq_shift = jnp.fft.fftshift(freq, axes=(-2, -1))
    yy, zz = jnp.meshgrid(jnp.arange(h), jnp.arange(w), indexing="ij")
    cy, cz = (h - 1) // 2, (w - 1) // 2
    dis_sq = (yy - cy) ** 2 + (zz - cz) ** 2
    low_filter = jnp.exp(-dis_sq.astype(jnp.float32) / (2.0 * d0 * d0))
    low_ishift = jnp.fft.ifftshift(freq_shift * low_filter, axes=(-2, -1))
    freq_x = jnp.abs(jnp.fft.ifft2(low_ishift)).astype(jnp.float32)

    pooled = jnp.mean(freq_x, axis=(2, 3), keepdims=True)                  # (N,C,1,1)
    atten = jax.nn.sigmoid(jnp.einsum("oc,nchw->nohw", w_atten, pooled))
    x2 = x + x * atten
    y = jnp.einsum("oc,nchw->nohw", w_conv, x2)
    mu = jnp.mean(y, axis=(0, 2, 3), keepdims=True)
    var = jnp.mean((y - mu) ** 2, axis=(0, 2, 3), keepdims=True)
    y = (y - mu) / jnp.sqrt(var + _EPS)
    y = y * gamma.reshape(1, -1, 1, 1) + beta.reshape(1, -1, 1, 1)
    return jnp.maximum(y, 0.0)


if __name__ == "__main__":
    key = jax.random.PRNGKey(0)
    k_x, k_wa, k_wc = jax.random.split(key, 3)

    N, C_IN, C_OUT, H, W = 2, 4, 8, 16, 16

    x = jax.random.normal(k_x, (N, C_IN, H, W), jnp.float32)
    # kaiming_normal_(a=1): gain = sqrt(2/(1+1)) = 1, std = 1/sqrt(fan_in)
    w_atten = jax.random.normal(k_wa, (C_IN, C_IN), jnp.float32) / jnp.sqrt(C_IN)
    w_conv = jax.random.normal(k_wc, (C_OUT, C_IN), jnp.float32) / jnp.sqrt(C_IN)
    # BatchNorm2d default affine init
    gamma = jnp.ones((C_OUT,), jnp.float32)
    beta = jnp.zeros((C_OUT,), jnp.float32)

    ref = jax.block_until_ready(_reference(x, w_atten, w_conv, gamma, beta))

    # Strict f32 tile path: tight tolerance against the literal reference.
    out_f32 = jax.block_until_ready(
        feature_selection_fft_bn_relu(x, w_atten, w_conv, gamma, beta,
                                      compute_dtype=jnp.float32))
    assert out_f32.shape == (N, C_OUT, H, W), out_f32.shape
    err32 = float(jnp.max(jnp.abs(out_f32 - ref)))
    assert jnp.allclose(out_f32, ref, rtol=5e-4, atol=5e-4), err32

    # Default fast path (bf16 x / weight tiles, f32 accumulation + BN stats).
    out_bf16 = jax.block_until_ready(
        feature_selection_fft_bn_relu(x, w_atten, w_conv, gamma, beta))
    assert out_bf16.shape == (N, C_OUT, H, W), out_bf16.shape
    errbf = float(jnp.max(jnp.abs(out_bf16.astype(jnp.float32) - ref)))
    assert jnp.allclose(out_bf16.astype(jnp.float32), ref, rtol=5e-2, atol=5e-2), errbf

    print("KERNEL_OK")
</pallas_src>

<mosaic_0001>
module attributes {stable_mosaic.version = 11 : i64} {
  func.func @_stats_kernel(%arg0: i32, %arg1: i32, %arg2: i32, %arg3: memref<1x4x256xf32, #tpu.memory_space<vmem>>, %arg4: memref<1x8x4xf32, #tpu.memory_space<vmem>>, %arg5: memref<1x1x8x2xf32, #tpu.memory_space<vmem>>) attributes {dimension_semantics = [#tpu.dimension_semantics<parallel>, #tpu.dimension_semantics<parallel>, #tpu.dimension_semantics<arbitrary>], iteration_bounds = array<i64: 1, 2, 1>, scalar_prefetch = 0 : i64, scratch_operands = 0 : i64, tpu.core_type = #tpu.core_type<tc>, window_params = [{transform_indices = @transform_0, window_bounds = array<i64: 1, 4, 256>}, {transform_indices = @transform_1, window_bounds = array<i64: 1, 8, 4>}, {transform_indices = @transform_2, window_bounds = array<i64: 1, 1, 8, 2>}]} {
    %c0_i32 = arith.constant 0 : i32
    %0 = arith.cmpi eq, %arg2, %c0_i32 : i32
    %1 = arith.extui %0 : i1 to i32
    %c0_i32_0 = arith.constant 0 : i32
    %2 = arith.cmpi ne, %1, %c0_i32_0 : i32
    scf.if %2 {
      %cst_23 = arith.constant 0.000000e+00 : f32
      %25 = vector.broadcast %cst_23 : f32 to vector<1x1x8x2xf32>
      %c0_24 = arith.constant 0 : index
      %c0_25 = arith.constant 0 : index
      %c0_26 = arith.constant 0 : index
      %c0_27 = arith.constant 0 : index
      %26 = vector.load %arg5[%c0_24, %c0_25, %c0_26, %c0_27] : memref<1x1x8x2xf32, #tpu.memory_space<vmem>>, vector<1x1x8x2xf32>
      tpu.vector_store %arg5[%c0_24, %c0_25, %c0_26, %c0_27], %25 {strides = array<i32>} : memref<1x1x8x2xf32, #tpu.memory_space<vmem>>, vector<1x1x8x2xf32>,
    } else {
    }
    %c0 = arith.constant 0 : index
    %c0_1 = arith.constant 0 : index
    %c0_2 = arith.constant 0 : index
    %3 = vector.load %arg4[%c0, %c0_1, %c0_2] : memref<1x8x4xf32, #tpu.memory_space<vmem>>, vector<1x8x4xf32>
    %4 = vector.shape_cast %3 : vector<1x8x4xf32> to vector<8x4xf32>
    %c0_3 = arith.constant 0 : index
    %c0_4 = arith.constant 0 : index
    %c0_5 = arith.constant 0 : index
    %5 = vector.load %arg3[%c0_3, %c0_4, %c0_5] : memref<1x4x256xf32, #tpu.memory_space<vmem>>, vector<1x4x256xf32>
    %6 = vector.shape_cast %5 : vector<1x4x256xf32> to vector<4x256xf32>
    %cst = arith.constant dense<0.000000e+00> : vector<8x256xf32>
    %7 = tpu.matmul %4, %6, %cst {dimension_numbers = #tpu.dot_dimension_numbers<[1], [0], [0], [1], [0, 0, 1, 1], [], []>} : vector<8x4xf32>, vector<4x256xf32>, vector<8x256xf32> -> vector<8x256xf32>
    %c0_6 = arith.constant 0 : index
    %c0_7 = arith.constant 0 : index
    %c0_8 = arith.constant 0 : index
    %c0_9 = arith.constant 0 : index
    %8 = vector.load %arg5[%c0_6, %c0_7, %c0_8, %c0_9] : memref<1x1x8x2xf32, #tpu.memory_space<vmem>>, vector<1x1x8x1xf32>
    %9 = vector.shape_cast %8 : vector<1x1x8x1xf32> to vector<8x1xf32>
    %cst_10 = arith.constant dense<0.000000e+00> : vector<8xf32>
    %10 = vector.multi_reduction <add>, %7, %cst_10 [1] : vector<8x256xf32> to vector<8xf32>
    %11 = vector.shape_cast %10 : vector<8xf32> to vector<8x1xf32>
    %12 = arith.addf %9, %11 : vector<8x1xf32>
    %c0_11 = arith.constant 0 : index
    %c0_12 = arith.constant 0 : index
    %c0_13 = arith.constant 0 : index
    %c0_14 = arith.constant 0 : index
    %13 = vector.load %arg5[%c0_11, %c0_12, %c0_13, %c0_14] : memref<1x1x8x2xf32, #tpu.memory_space<vmem>>, vector<1x1x8x1xf32>
    %14 = vector.shape_cast %13 : vector<1x1x8x1xf32> to vector<8x1xf32>
    %15 = vector.shape_cast %12 : vector<8x1xf32> to vector<1x1x8x1xf32>
    tpu.vector_store %arg5[%c0_11, %c0_12, %c0_13, %c0_14], %15 {strides = array<i32>} : memref<1x1x8x2xf32, #tpu.memory_space<vmem>>, vector<1x1x8x1xf32>,
    %c0_15 = arith.constant 0 : index
    %c0_16 = arith.constant 0 : index
    %c0_17 = arith.constant 0 : index
    %c1 = arith.constant 1 : index
    %16 = vector.load %arg5[%c0_15, %c0_16, %c0_17, %c1] : memref<1x1x8x2xf32, #tpu.memory_space<vmem>>, vector<1x1x8x1xf32>
    %17 = vector.shape_cast %16 : vector<1x1x8x1xf32> to vector<8x1xf32>
    %18 = arith.mulf %7, %7 : vector<8x256xf32>
    %cst_18 = arith.constant dense<0.000000e+00> : vector<8xf32>
    %19 = vector.multi_reduction <add>, %18, %cst_18 [1] : vector<8x256xf32> to vector<8xf32>
    %20 = vector.shape_cast %19 : vector<8xf32> to vector<8x1xf32>
    %21 = arith.addf %17, %20 : vector<8x1xf32>
    %c0_19 = arith.constant 0 : index
    %c0_20 = arith.constant 0 : index
    %c0_21 = arith.constant 0 : index
    %c1_22 = arith.constant 1 : index
    %22 = vector.load %arg5[%c0_19, %c0_20, %c0_21, %c1_22] : memref<1x1x8x2xf32, #tpu.memory_space<vmem>>, vector<1x1x8x1xf32>
    %23 = vector.shape_cast %22 : vector<1x1x8x1xf32> to vector<8x1xf32>
    %24 = vector.shape_cast %21 : vector<8x1xf32> to vector<1x1x8x1xf32>
    tpu.vector_store %arg5[%c0_19, %c0_20, %c0_21, %c1_22], %24 {strides = array<i32>} : memref<1x1x8x2xf32, #tpu.memory_space<vmem>>, vector<1x1x8x1xf32>,
    return
  }
  func.func @transform_0(%arg0: i32, %arg1: i32, %arg2: i32) -> (i32, i32, i32) {
    %c1_i32 = arith.constant 1 : i32
    %0 = arith.muli %arg0, %c1_i32 : i32
    %1 = arith.addi %0, %arg2 : i32
    %c0_i32 = arith.constant 0 : i32
    %c0_i32_0 = arith.constant 0 : i32
    return %arg1, %c0_i32, %1 : i32, i32, i32
  }
  func.func @transform_1(%arg0: i32, %arg1: i32, %arg2: i32) -> (i32, i32, i32) {
    %c0_i32 = arith.constant 0 : i32
    %c0_i32_0 = arith.constant 0 : i32
    %c0_i32_1 = arith.constant 0 : i32
    return %arg1, %c0_i32, %c0_i32_0 : i32, i32, i32
  }
  func.func @transform_2(%arg0: i32, %arg1: i32, %arg2: i32) -> (i32, i32, i32, i32) {
    %c0_i32 = arith.constant 0 : i32
    %c0_i32_0 = arith.constant 0 : i32
    %c0_i32_1 = arith.constant 0 : i32
    return %arg0, %arg1, %c0_i32, %c0_i32_0 : i32, i32, i32, i32
  }
}

module attributes {stable_mosaic.version = 11 : i64} {
  func.func @_apply_kernel(%arg0: i32, %arg1: i32, %arg2: memref<1x4x256xf32, #tpu.memory_space<vmem>>, %arg3: memref<1x8x4xf32, #tpu.memory_space<vmem>>, %arg4: memref<8x1xf32, #tpu.memory_space<vmem>>, %arg5: memref<1x8x256xf32, #tpu.memory_space<vmem>>) attributes {dimension_semantics = [#tpu.dimension_semantics<parallel>, #tpu.dimension_semantics<parallel>], iteration_bounds = array<i64: 2, 1>, scalar_prefetch = 0 : i64, scratch_operands = 0 : i64, tpu.core_type = #tpu.core_type<tc>, window_params = [{transform_indices = @transform_0, window_bounds = array<i64: 1, 4, 256>}, {transform_indices = @transform_1, window_bounds = array<i64: 1, 8, 4>}, {pipeline_mode = #tpu.pipeline_mode<synchronous>, transform_indices = @transform_2, window_bounds = array<i64: 8, 1>}, {transform_indices = @transform_3, window_bounds = array<i64: 1, 8, 256>}]} {
    %c0 = arith.constant 0 : index
    %c0_0 = arith.constant 0 : index
    %c0_1 = arith.constant 0 : index
    %0 = vector.load %arg3[%c0, %c0_0, %c0_1] : memref<1x8x4xf32, #tpu.memory_space<vmem>>, vector<1x8x4xf32>
    %1 = vector.shape_cast %0 : vector<1x8x4xf32> to vector<8x4xf32>
    %c0_2 = arith.constant 0 : index
    %c0_3 = arith.constant 0 : index
    %c0_4 = arith.constant 0 : index
    %2 = vector.load %arg2[%c0_2, %c0_3, %c0_4] : memref<1x4x256xf32, #tpu.memory_space<vmem>>, vector<1x4x256xf32>
    %3 = vector.shape_cast %2 : vector<1x4x256xf32> to vector<4x256xf32>
    %cst = arith.constant dense<0.000000e+00> : vector<8x256xf32>
    %4 = tpu.matmul %1, %3, %cst {dimension_numbers = #tpu.dot_dimension_numbers<[1], [0], [0], [1], [0, 0, 1, 1], [], []>} : vector<8x4xf32>, vector<4x256xf32>, vector<8x256xf32> -> vector<8x256xf32>
    %c0_5 = arith.constant 0 : index
    %c0_6 = arith.constant 0 : index
    %5 = vector.load %arg4[%c0_5, %c0_6] : memref<8x1xf32, #tpu.memory_space<vmem>>, vector<8x1xf32>
    %6 = vector.broadcast %5 : vector<8x1xf32> to vector<8x256xf32>
    %7 = arith.addf %4, %6 : vector<8x256xf32>
    %cst_7 = arith.constant 0.000000e+00 : f32
    %8 = vector.broadcast %cst_7 : f32 to vector<8x256xf32>
    %9 = arith.maximumf %7, %8 : vector<8x256xf32>
    %c0_8 = arith.constant 0 : index
    %c0_9 = arith.constant 0 : index
    %c0_10 = arith.constant 0 : index
    %10 = vector.load %arg5[%c0_8, %c0_9, %c0_10] : memref<1x8x256xf32, #tpu.memory_space<vmem>>, vector<1x8x256xf32>
    %11 = vector.shape_cast %10 : vector<1x8x256xf32> to vector<8x256xf32>
    %12 = vector.shape_cast %9 : vector<8x256xf32> to vector<1x8x256xf32>
    tpu.vector_store %arg5[%c0_8, %c0_9, %c0_10], %12 {strides = array<i32>} : memref<1x8x256xf32, #tpu.memory_space<vmem>>, vector<1x8x256xf32>,
    return
  }
  func.func @transform_0(%arg0: i32, %arg1: i32) -> (i32, i32, i32) {
    %c0_i32 = arith.constant 0 : i32
    %c0_i32_0 = arith.constant 0 : i32
    return %arg0, %c0_i32, %arg1 : i32, i32, i32
  }
  func.func @transform_1(%arg0: i32, %arg1: i32) -> (i32, i32, i32) {
    %c0_i32 = arith.constant 0 : i32
    %c0_i32_0 = arith.constant 0 : i32
    %c0_i32_1 = arith.constant 0 : i32
    return %arg0, %c0_i32, %c0_i32_0 : i32, i32, i32
  }
  func.func @transform_2(%arg0: i32, %arg1: i32) -> (i32, i32) {
    %c0_i32 = arith.constant 0 : i32
    %c0_i32_0 = arith.constant 0 : i32
    %c0_i32_1 = arith.constant 0 : i32
    return %c0_i32, %c0_i32_0 : i32, i32
  }
  func.func @transform_3(%arg0: i32, %arg1: i32) -> (i32, i32, i32) {
    %c0_i32 = arith.constant 0 : i32
    %c0_i32_0 = arith.constant 0 : i32
    return %arg0, %c0_i32, %arg1 : i32, i32, i32
  }
}

</mosaic_0001>

<bundles_post_ra>
// kernel: feature_selection_fft_bn_relu.2
= control target key start
LH: loop header
LB: loop body
LE: loop exit
PB: predicated region body
PF: predicated region fallthrough
CT: control target
= control target key end

     0   :  { %s496_s9 = smov 0   ;;  %s498_s10 = smov 0   ;;  %s532_s0 = inlined_call_operand.vmem [shape: f32[2,4,256], index: 0, kind: input, shape index: {}]   ;;  %s533_s1 = inlined_call_operand.vmem [shape: f32[2,8,4], index: 1, kind: input, shape index: {}]   ;;  %s534_s2 = inlined_call_operand.vmem [shape: f32[1,2,8,2], index: 2, kind: output, shape index: {}]  }
   0x1   :  { %s500_s11 = smov 0  }
   0x2 LB: > { %s27_s12 = sadd.s32 1, %s474_s10  ;;  %p419_p0 = scmp.ge.s32.totalorder %s478_s11, 1  ;;  %s478_s11 = sphi %s500_s11, %s12_s11   ;;  %s474_s10 = sphi %s498_s10, %s536_s10   ;;  %s470_s9 = sphi %s496_s9, %s535_s9  }
   0x3   : > { %p29_p1 = scmp.ge.s32.totalorder %s27_s12, 2  ;;  %p153_p2 = scmp.lt.s32.totalorder %s478_s11, 3 }
   0x5   : > { %s538_s12 = smov (%p29_p1, %s27_s12), 0  ;;  %p154_p3 = pnand %p419_p0, %p153_p2 }
   0x6   : > { %p189_p4 = scmp.lt.s32.totalorder (!%p154_p3), %s470_s9, 1  ;;  %v480_v0 = vmov (!%p154_p3), 0.0   ;;  %vm215_vm0 = vcmask (!%p154_p3), 15360   ;;  %vm225_vm1 = vcmask (!%p154_p3), 1043456   ;;  %vm221_vm2 = vcmask (!%p154_p3), 31744  }
   0x7   : > { %157 = sbr.rel (%p154_p3) target bundleno = 392 (0x188), region = 28  ;;  %294 = vmatprep.mubr.f32.mxu0 (!%p154_p3), %v480_v0  ;;  %vm306_vm3 = vcmask (!%p154_p3), 7168   ;;  %vm315_vm4 = vcmask (!%p154_p3), 15368  }
   0xe   : > { %s540_s9 = smov (!%p189_p4, %s470_s9), 1 }
   0xf   : > { %s429_s13 = sshll.u32 %s540_s9, 3 }
  0x10   : > { %s196_s16 = scalar_lea.vmem %s532_s0, %s429_s13  ;;  %s210_s19 = scalar_lea.vmem %s534_s2, %s429_s13 }
  0x11   : > { %v218_v1 = vld [vmem:[%s196_s16] sm:$0xff]  ;;  %216 = vst.msk [vmem:[%s210_s19] sm:$0xff] %vm215_vm0, %v480_v0  ;;  %s202_s22 = scalar_lea.vmem %s533_s1, %s429_s13 }
  0x12   : > { %v220_v2 = vcombine.high %v218_v1, %v218_v1  ;;  %v217_v3 = vld [vmem:[%s202_s22] sm:$0xff] }
  0x14   : > { %424 = vmatprep.subr.msk.mxu0 %vm225_vm1, %v220_v2 }
  0x15   : > { %425 = vmatpush1.msk.msra.mxu0 %vm225_vm1, %v218_v1 }
  0x16   : > { %426 = vmatmul.mubr.msk.f32.vlgmr.msra.gmra.mrb[0].mxu0 %vm221_vm2, %v217_v3 }
  0x18   : > { %v301_v10 = vld [vmem:[%s210_s19] sm:$0xff] }
  0xe9   : > { %v296_v4 = vpop.f32.mrb[0].mxu0 }
  0xea   : > { %v309_v5 = vmul.f32 %v296_v4, %v296_v4  ;;  %v298_v6 = vpop.f32.mrb[1].mxu0 }
  0xeb   : > { %v310_v7 = vmul.f32 %v298_v6, %v298_v6  ;;  %v302_v8 = vadd.f32 %v298_v6, %v296_v4 }
  0xed   : > { %303 = vadd.xlane.f32.xlu0 %v302_v8  ;;  %v311_v9 = vadd.f32 %v310_v7, %v309_v5 }
  0xf1   : > { %312 = vadd.xlane.f32.xlu0 %v311_v9 }
 0x17a   : > { %v304_v11 = vpop.xlane.xlu0 %303 }
 0x17b   : > { %v305_v12 = vadd.f32 %v304_v11, %v301_v10 }
 0x17d   : > { %307 = vst.msk [vmem:[%s210_s19] sm:$0xff] %vm306_vm3, %v305_v12 }
 0x17e   : > { %v313_v14 = vpop.xlane.xlu0 %312 }
 0x184   : > { %v308_v13 = vld [vmem:[%s210_s19] sm:$0xff] }
 0x185   : > { %v314_v15 = vadd.f32 %v313_v14, %v308_v13 }
 0x187   : > { %316 = vst.msk [vmem:[%s210_s19] sm:$0xff] %vm315_vm4, %v314_v15 }
 0x188 PF: > { %s12_s11 = sadd.s32 1, %s478_s11   ;;  %s535_s9 = smov %s474_s10 }
 0x189   : > { %p9_p5 = scmp.ge.s32.totalorder %s12_s11, 4   ;;  %s536_s10 = smov %s538_s12 }
 0x18b   :  { %11 = sbr.rel (!%p9_p5) target bundleno = 2 (0x2), region = 65 }

// kernel: feature_selection_fft_bn_relu.3
= control target key start
LH: loop header
LB: loop body
LE: loop exit
PB: predicated region body
PF: predicated region fallthrough
CT: control target
= control target key end

     0   :  { %s511_s12 = smov 0   ;;  %s513_s13 = smov 0   ;;  %s550_s0 = inlined_call_operand.vmem [shape: f32[2,4,256], index: 0, kind: input, shape index: {}]   ;;  %s551_s1 = inlined_call_operand.vmem [shape: f32[2,8,4], index: 1, kind: input, shape index: {}]   ;;  %s552_s2 = inlined_call_operand.vmem [shape: f32[8,1], index: 2, kind: input, shape index: {}]   ;;  %s553_s3 = inlined_call_operand.vmem [shape: f32[2,8,256], index: 3, kind: output, shape index: {}]  }
   0x1   :  { %s515_s14 = smov 0  }
   0x2 LB: > { %s25_s15 = sadd.s32 1, %s483_s13  ;;  %p424_p0 = scmp.ge.s32.totalorder %s487_s14, 1  ;;  %s487_s14 = sphi %s515_s14, %s13_s14   ;;  %s483_s13 = sphi %s513_s13, %s555_s13   ;;  %s479_s12 = sphi %s511_s12, %s554_s12  }
   0x3   : > { %p27_p1 = scmp.ge.s32.totalorder %s25_s15, 2  ;;  %p167_p2 = scmp.lt.s32.totalorder %s487_s14, 3 }
   0x5   : > { %s557_s15 = smov (%p27_p1, %s25_s15), 0  ;;  %p168_p3 = pnand %p424_p0, %p167_p2 }
   0x6   : > { %p204_p4 = scmp.lt.s32.totalorder (!%p168_p3), %s479_s12, 1  ;;  %v229_v0 = vld [vmem:[%s552_s2] sm:$0xff] (!%p168_p3)  ;;  %v489_v1 = vmov (!%p168_p3), 0.0   ;;  %v490_v2 = vmov (!%p168_p3), 0   ;;  %vm241_vm0 = vcmask (!%p168_p3), 1043456   ;;  %vm237_vm1 = vcmask (!%p168_p3), 31744  }
   0x7   : > { %171 = sbr.rel (%p168_p3) target bundleno = 240 (0xf0), region = 32  ;;  %310 = vmatprep.mubr.f32.mxu0 (!%p168_p3), %v489_v1  ;;  %463 = vset.pattern.permute.xlu0 (!%p168_p3), %v490_v2 }
   0x8   : > { %232 = vperm.xlu0 (!%p168_p3), %463, %v229_v0  }
   0xe   : > { %s559_s12 = smov (!%p204_p4, %s479_s12), 1 }
   0xf   : > { %s435_s18 = sshll.u32 %s559_s12, 3  ;;  %s436_s25 = sshll.u32 %s559_s12, 4 }
  0x10   : > { %s211_s21 = scalar_lea.vmem %s550_s0, %s435_s18  ;;  %s216_s24 = scalar_lea.vmem %s551_s1, %s435_s18 }
  0x11   : > { %v228_v3 = vld [vmem:[%s211_s21] sm:$0xff]  ;;  %s225_s28 = scalar_lea.vmem %s553_s3, %s436_s25 }
  0x12   : > { %v236_v4 = vcombine.high %v228_v3, %v228_v3  ;;  %v227_v5 = vld [vmem:[%s216_s24] sm:$0xff] }
  0x14   : > { %430 = vmatprep.subr.msk.mxu0 %vm241_vm0, %v236_v4 }
  0x15   : > { %431 = vmatpush1.msk.msra.mxu0 %vm241_vm0, %v228_v3 }
  0x16   : > { %432 = vmatmul.mubr.msk.f32.vlgmr.msra.gmra.mrb[0].mxu0 %vm237_vm1, %v227_v5 }
  0x87   : > { %v233_v6 = vpop.permute.xlu0 %232 }
  0xe9   : > { %v312_v7 = vpop.f32.mrb[0].mxu0 }
  0xea   : > { %v313_v8 = vadd.f32 %v312_v7, %v233_v6  ;;  %v314_v9 = vpop.f32.mrb[1].mxu0 }
  0xeb   : > { %v315_v10 = vadd.f32 %v314_v9, %v233_v6 }
  0xec   : > { %v317_v11 = vmax.f32 %v313_v8, 0.0 }
  0xed   : > { %v318_v12 = vmax.f32 %v315_v10, 0.0 }
  0xee   : > { %319 = vst [vmem:[%s225_s28] sm:$0xff] %v317_v11 }
  0xef   : > { %320 = vst [vmem:[%s225_s28 + $0x8] sm:$0xff] %v318_v12 }
  0xf0 PF: > { %s13_s14 = sadd.s32 1, %s487_s14   ;;  %s554_s12 = smov %s483_s13 }
  0xf1   : > { %p10_p5 = scmp.ge.s32.totalorder %s13_s14, 4   ;;  %s555_s13 = smov %s557_s15 }
  0xf3   :  { %12 = sbr.rel (!%p10_p5) target bundleno = 2 (0x2), region = 65 }

</bundles_post_ra>
